<compile_context>
chip_gen: v7x
topology: tpu7x:2x2x1
jax: 0.10.0
libtpu: 0.0.40
codegen_flags: <defaults>
</compile_context>

<pallas_src>
import functools
import math

import jax
import jax.numpy as jnp
from jax.experimental import pallas as pl
from jax.experimental.pallas import tpu as pltpu


def fuse_qkv_weights(w_query, w_key, w_value):
    """One-time parameter prep: fuse W_q | W_k | W_v and bake in the softmax scale.

    In a real module this fused array *is* the stored parameter, so neither the
    concatenation nor the 1/sqrt(out_dim) scaling appears on the per-forward
    hot path.  Folding the scale into the query columns is mathematically
    identical to dividing the attention scores by sqrt(out_dim).
    """
    out_dim = w_key.shape[-1]
    scale = 1.0 / math.sqrt(out_dim)  # matches key.shape[-1] ** 0.5
    return jnp.concatenate([w_query * scale, w_key, w_value], axis=1)


def _self_attention_kernel(x_ref, w_qkv_ref, o_ref, *, out_dim):
    bb, s, inp_dim = x_ref.shape

    x = x_ref[...]           # (BB, S, inp_dim)       f32
    w_qkv = w_qkv_ref[...]   # (inp_dim, 3*out_dim)   f32, query cols pre-scaled

    # Fused Q/K/V projection for the whole batch block: one 2-D MXU matmul with
    # BB*S rows (leading-dim reshape only; last dim untouched -> no relayout).
    qkv = jnp.dot(x.reshape(bb * s, inp_dim), w_qkv,
                  preferred_element_type=jnp.float32)
    qkv = qkv.reshape(bb, s, 3 * out_dim)

    q = qkv[..., :out_dim]               # scale already folded into the weight
    k = qkv[..., out_dim:2 * out_dim]
    v = qkv[..., 2 * out_dim:]

    # Batched attention scores: contract on the feature axis (no explicit k^T).
    scores = jnp.einsum("bqe,bke->bqk", q, k,
                        preferred_element_type=jnp.float32)     # (BB, S, S)

    # Numerically-stable softmax with exact normalization (approx reciprocal
    # only pays off in a gridded version where the denom is O(seq*tile)).
    m = jnp.max(scores, axis=-1, keepdims=True)
    e = jnp.exp(scores - m)
    att_weight = e / jnp.sum(e, axis=-1, keepdims=True)

    # Context vectors: (BB, S, out_dim).
    # NOTE: for large batch*out_dim, pack the output lane-dense
    # ((S, heads*out_dim) / batch-along-lanes) so stores use unmasked 128-lane
    # vst; at out_dim=16 the (8,16) tile store cost is negligible.
    ctx = jnp.einsum("bqk,bke->bqe", att_weight, v,
                     preferred_element_type=jnp.float32)
    o_ref[...] = ctx.astype(o_ref.dtype)


def _pick_batch_block(batch):
    # A few grid steps (instead of one giant block) lets a v7x chip's two
    # TensorCores each take work via the "parallel" axis, while still
    # amortizing the ~0.35 us/step overhead over several sequences.
    for bb in (4, 2, 1):
        if batch % bb == 0:
            return bb
    return 1


def self_attention_v0(x, w_qkv_fused, *, batch_block=None):
    """Pallas forward equivalent to SelfAttentionV0.forward.

    x: (seq, inp_dim) exactly like the PyTorch module, or (batch, seq, inp_dim)
       to amortize launch overhead over many sequences in one pallas_call.
    w_qkv_fused: output of fuse_qkv_weights() (prepared once, off the hot path).
    """
    squeeze = x.ndim == 2
    if squeeze:
        x = x[None]
    batch, seq, inp_dim = x.shape
    out_dim = w_qkv_fused.shape[1] // 3

    if batch_block is None:
        batch_block = _pick_batch_block(batch)
    assert batch % batch_block == 0, "batch must be divisible by batch_block"

    kernel = functools.partial(_self_attention_kernel, out_dim=out_dim)

    out = pl.pallas_call(
        kernel,
        out_shape=jax.ShapeDtypeStruct((batch, seq, out_dim), jnp.float32),
        grid_spec=pltpu.PrefetchScalarGridSpec(
            num_scalar_prefetch=0,
            grid=(batch // batch_block,),
            in_specs=[
                pl.BlockSpec((batch_block, seq, inp_dim), lambda b: (b, 0, 0)),
                pl.BlockSpec((inp_dim, 3 * out_dim), lambda b: (0, 0)),
            ],
            out_specs=pl.BlockSpec((batch_block, seq, out_dim),
                                   lambda b: (b, 0, 0)),
        ),
        compiler_params=pltpu.CompilerParams(
            dimension_semantics=("parallel",),   # 2x on v7x; no-op on v5e/v6e
        ),
    )(x, w_qkv_fused)

    return out[0] if squeeze else out


def _reference(x, w_query, w_key, w_value):
    hp = jax.lax.Precision.HIGHEST
    key = jnp.dot(x, w_key, precision=hp)
    value = jnp.dot(x, w_value, precision=hp)
    query = jnp.dot(x, w_query, precision=hp)
    att_score = jnp.dot(query, key.T, precision=hp)
    att_weight = jax.nn.softmax(att_score / key.shape[-1] ** 0.5, axis=-1)
    return jnp.dot(att_weight, value, precision=hp)


if __name__ == "__main__":
    # Small shapes consistent with the module: seq=8, inp_dim=32, out_dim=16,
    # plus a batch of 8 sequences to exercise the batched (gridded) path.
    batch, seq, inp_dim, out_dim = 8, 8, 32, 16

    root = jax.random.PRNGKey(0)
    kx, kq, kk, kv = jax.random.split(root, 4)

    x = jax.random.uniform(kx, (batch, seq, inp_dim), dtype=jnp.float32)
    # torch.rand -> uniform [0, 1), matched deterministically here.
    w_query = jax.random.uniform(kq, (inp_dim, out_dim), dtype=jnp.float32)
    w_key = jax.random.uniform(kk, (inp_dim, out_dim), dtype=jnp.float32)
    w_value = jax.random.uniform(kv, (inp_dim, out_dim), dtype=jnp.float32)

    # One-time parameter prep (off the per-forward hot path).
    w_qkv = fuse_qkv_weights(w_query, w_key, w_value)

    # Batched call: 8 sequences in one pallas_call (grid=(2,), 4 per step).
    out = jax.block_until_ready(self_attention_v0(x, w_qkv))
    ref = jax.vmap(lambda xb: _reference(xb, w_query, w_key, w_value))(x)
    assert out.shape == (batch, seq, out_dim)
    assert jnp.allclose(out, ref, atol=1e-4, rtol=1e-4), "batched mismatch vs reference"

    # Single-sequence path, identical to the PyTorch module's signature.
    out1 = jax.block_until_ready(self_attention_v0(x[0], w_qkv))
    assert out1.shape == (seq, out_dim)
    assert jnp.allclose(out1, ref[0], atol=1e-4, rtol=1e-4), "2-D mismatch vs reference"

    print("KERNEL_OK")
</pallas_src>

<mosaic_0001>
module attributes {stable_mosaic.version = 11 : i64} {
  func.func @_self_attention_kernel(%arg0: i32, %arg1: memref<4x8x32xf32, #tpu.memory_space<vmem>>, %arg2: memref<32x48xf32, #tpu.memory_space<vmem>>, %arg3: memref<4x8x16xf32, #tpu.memory_space<vmem>>) attributes {dimension_semantics = [#tpu.dimension_semantics<parallel>], iteration_bounds = array<i64: 2>, scalar_prefetch = 0 : i64, scratch_operands = 0 : i64, tpu.core_type = #tpu.core_type<tc>, window_params = [{transform_indices = @transform_0, window_bounds = array<i64: 4, 8, 32>}, {pipeline_mode = #tpu.pipeline_mode<synchronous>, transform_indices = @transform_1, window_bounds = array<i64: 32, 48>}, {transform_indices = @transform_2, window_bounds = array<i64: 4, 8, 16>}]} {
    %c0 = arith.constant 0 : index
    %c0_0 = arith.constant 0 : index
    %c0_1 = arith.constant 0 : index
    %0 = vector.load %arg1[%c0, %c0_0, %c0_1] : memref<4x8x32xf32, #tpu.memory_space<vmem>>, vector<4x8x32xf32>
    %c0_2 = arith.constant 0 : index
    %c0_3 = arith.constant 0 : index
    %1 = vector.load %arg2[%c0_2, %c0_3] : memref<32x48xf32, #tpu.memory_space<vmem>>, vector<32x48xf32>
    %2 = vector.shape_cast %0 : vector<4x8x32xf32> to vector<32x32xf32>
    %cst = arith.constant dense<0.000000e+00> : vector<32x48xf32>
    %3 = tpu.matmul %2, %1, %cst {dimension_numbers = #tpu.dot_dimension_numbers<[1], [0], [0], [1], [0, 0, 1, 1], [], []>} : vector<32x32xf32>, vector<32x48xf32>, vector<32x48xf32> -> vector<32x48xf32>
    %4 = vector.shape_cast %3 : vector<32x48xf32> to vector<4x8x48xf32>
    %5 = vector.extract_strided_slice %4 {offsets = [0, 0, 0], sizes = [4, 8, 16], strides = [1, 1, 1]} : vector<4x8x48xf32> to vector<4x8x16xf32>
    %6 = vector.extract_strided_slice %4 {offsets = [0, 0, 16], sizes = [4, 8, 16], strides = [1, 1, 1]} : vector<4x8x48xf32> to vector<4x8x16xf32>
    %7 = vector.extract_strided_slice %4 {offsets = [0, 0, 32], sizes = [4, 8, 16], strides = [1, 1, 1]} : vector<4x8x48xf32> to vector<4x8x16xf32>
    "tpu.trace_start"() <{level = 10 : i32, message = "bqe,bke->bqk"}> : () -> ()
    %cst_4 = arith.constant dense<0.000000e+00> : vector<4x8x8xf32>
    %8 = tpu.matmul %5, %6, %cst_4 {dimension_numbers = #tpu.dot_dimension_numbers<[2], [2], [1], [1], [0, 0, 0, 1, 1, 1], [0], [0]>} : vector<4x8x16xf32>, vector<4x8x16xf32>, vector<4x8x8xf32> -> vector<4x8x8xf32>
    "tpu.trace_stop"() : () -> ()
    %cst_5 = arith.constant dense<0xFF800000> : vector<4x8xf32>
    %9 = vector.multi_reduction <maximumf>, %8, %cst_5 [2] : vector<4x8x8xf32> to vector<4x8xf32>
    %10 = vector.shape_cast %9 : vector<4x8xf32> to vector<4x8x1xf32>
    %11 = vector.broadcast %10 : vector<4x8x1xf32> to vector<4x8x8xf32>
    %12 = arith.subf %8, %11 : vector<4x8x8xf32>
    %13 = math.exp %12 : vector<4x8x8xf32>
    %cst_6 = arith.constant dense<0.000000e+00> : vector<4x8xf32>
    %14 = vector.multi_reduction <add>, %13, %cst_6 [2] : vector<4x8x8xf32> to vector<4x8xf32>
    %15 = vector.shape_cast %14 : vector<4x8xf32> to vector<4x8x1xf32>
    %16 = vector.broadcast %15 : vector<4x8x1xf32> to vector<4x8x8xf32>
    %17 = arith.divf %13, %16 : vector<4x8x8xf32>
    "tpu.trace_start"() <{level = 10 : i32, message = "bqk,bke->bqe"}> : () -> ()
    %cst_7 = arith.constant dense<0.000000e+00> : vector<4x8x16xf32>
    %18 = tpu.matmul %17, %7, %cst_7 {dimension_numbers = #tpu.dot_dimension_numbers<[2], [1], [1], [2], [0, 0, 0, 1, 1, 2], [0], [0]>} : vector<4x8x8xf32>, vector<4x8x16xf32>, vector<4x8x16xf32> -> vector<4x8x16xf32>
    "tpu.trace_stop"() : () -> ()
    %c0_8 = arith.constant 0 : index
    %c0_9 = arith.constant 0 : index
    %c0_10 = arith.constant 0 : index
    %19 = vector.load %arg3[%c0_8, %c0_9, %c0_10] : memref<4x8x16xf32, #tpu.memory_space<vmem>>, vector<4x8x16xf32>
    tpu.vector_store %arg3[%c0_8, %c0_9, %c0_10], %18 {strides = array<i32>} : memref<4x8x16xf32, #tpu.memory_space<vmem>>, vector<4x8x16xf32>,
    return
  }
  func.func @transform_0(%arg0: i32) -> (i32, i32, i32) {
    %c0_i32 = arith.constant 0 : i32
    %c0_i32_0 = arith.constant 0 : i32
    %c0_i32_1 = arith.constant 0 : i32
    return %arg0, %c0_i32, %c0_i32_0 : i32, i32, i32
  }
  func.func @transform_1(%arg0: i32) -> (i32, i32) {
    %c0_i32 = arith.constant 0 : i32
    %c0_i32_0 = arith.constant 0 : i32
    %c0_i32_1 = arith.constant 0 : i32
    return %c0_i32, %c0_i32_0 : i32, i32
  }
  func.func @transform_2(%arg0: i32) -> (i32, i32, i32) {
    %c0_i32 = arith.constant 0 : i32
    %c0_i32_0 = arith.constant 0 : i32
    %c0_i32_1 = arith.constant 0 : i32
    return %arg0, %c0_i32, %c0_i32_0 : i32, i32, i32
  }
}

</mosaic_0001>

<bundles_post_ra>
// kernel: tpu_custom_call.1
= control target key start
LH: loop header
LB: loop body
LE: loop exit
PB: predicated region body
PF: predicated region fallthrough
CT: control target
= control target key end

     0   :  { %7 = vsyncpa [#allocation3], 0  ;;  %s1683_s0 = inlined_call_operand.hbm [shape: f32[8,8,32], index: 0, kind: input, shape index: {}]   ;;  %s1684_s1 = inlined_call_operand.hbm [shape: f32[32,48], index: 1, kind: input, shape index: {}]   ;;  %s1685_s2 = inlined_call_operand.hbm [shape: f32[8,8,16], index: 2, kind: output, shape index: {}]  }
   0x1   :  { %9 = vsyncpa [#allocation3 + $0x1], 0 }
   0x2   :  { %10 = vsyncpa [#allocation6], 0 }
   0x3   :  { %11 = vsyncpa [#allocation4], 0 }
   0x4   :  { %13 = vsyncpa [#allocation4 + $0x1], 0  ;;  %s1401_s9 = smov 0   ;;  %s1403_s10 = smov 0  }
   0x5   :  { %s1405_s11 = smov 0   ;;  %s1407_s12 = smov 0  }
   0x6 LB: > { %s1422_s13 = sadd.s32 4294967295, %s1373_s12   ;;  %s1044_s14 = sadd.s32 4294967294, %s1373_s12   ;;  %s1373_s12 = sphi %s1407_s12, %s1705_s12   ;;  %s1369_s11 = sphi %s1405_s11, %s1704_s11   ;;  %s1365_s10 = sphi %s1403_s10, %s1703_s10   ;;  %s1361_s9 = sphi %s1401_s9, %s1702_s9  }
   0x7   : > { %p39_p0 = scmp.ne.s32.totalorder %s1365_s10, %s1361_s9  ;;  %p1686_p1 = scmp.eq.s32.totalorder %s1422_s13, 0 }
   0x8   : > { %p90_p3 = scmp.eq.s32.totalorder %s1044_s14, 1  ;;  %p1045_p5 = scmp.ge.s32.totalorder %s1373_s12, 1 }
   0x9   : > { %p1431_p4 = por %p1686_p1, %p39_p0  ;;  %p97_p7 = scmp.lt.s32.totalorder %s1373_s12, 3 }
   0xa   : > { %p1436_p6 = por %p90_p3, %p39_p0  ;;  %s1375_s18 = smov [#allocation5]  }
   0xb   : > { %s1689_s15 = scalar_select %p1431_p4, 1, 0 }
   0xc   : > { %s1690_s16 = scalar_select %p1436_p6, 1, 0 }
   0xd   : > { %p1441_p8 = pnand %p1045_p5, %p97_p7  ;;  %s109_s19 = sshll.u32 %s1375_s18, 4  ;;  %s1445_s19 = int_to_ptr.vmem [resolvable:$true] %s109_s19 }
   0xe   : > { %s1457_s21 = sadd.s32 1, %s1373_s12   ;;  %s26_s22 = sadd.s32 1, %s1369_s11 }
   0xf   : > { %s1691_s17 = scalar_select %p1441_p8, 1, 0 }
  0x10   : > { %p1172_p9 = pneg %p1441_p8  ;;  %s23_s23 = ssub.s32 %s1373_s12, %s1457_s21 }
  0x11   : > { %s1245_s26 = scalar_lea.hbm %s1684_s1, 512 }
  0x12   : > { %p1452_p11 = pnand %p1172_p9, %p1686_p1  ;;  %p1246_p12 = scmp.ne.s32.totalorder %s1684_s1, %s1245_s26 }
  0x13   : > { %p1252_p5 = scmp.lt.u32.totalorder %s1245_s26, %s1684_s1 }
  0x14   : > { %p1247_p13 = pneg %p1452_p11 }
  0x16   : > { %p1248_p0 = pnand %p1247_p13, %p1246_p12 }
  0x18   : > { %p1249_p3 = pneg %p1248_p0 }
  0x1a   : > { %p1254_p7 = pnand %p1252_p5, %p1249_p3 }
  0x1c   : > { %1257 = shalt.err (!%p1254_p7)
}
  0x1d   : > { %s1258_s3 = scalar_lea.vmem %s1445_s19, 512  ;;  %p1266_p2 = scmp.lt.s32.totalorder %s1445_s19, %s1445_s19 }
  0x1e   : > { %p1259_p9 = scmp.ne.s32.totalorder %s1445_s19, %s1258_s3  ;;  %p1267_p6 = scmp.lt.s32.totalorder %s1258_s3, %s1258_s3 }
  0x20   : > { %p1261_p10 = pnand %p1259_p9, %p1247_p13  ;;  %p1268_p4 = por %p1267_p6, %p1266_p2 }
  0x22   : > { %p1262_p1 = pneg %p1261_p10 }
  0x24   : > { %p1269_p8 = pnand %p1268_p4, %p1262_p1 }
  0x26   : > { %1272 = shalt.err (!%p1269_p8)
}
  0x27   : > { %s1376_s4 = smov 128   ;;  %s1377_s5 = smov 8  }
  0x28   : > { %1175 = dma.hbm_to_vmem [thread:$0]  (!%p1452_p11), %s1684_s1, 512, %s1445_s19, [#allocation6], %s1376_s4, %s1376_s4, %s1377_s5  }
  0x29   : > { %p24_p1 = scmp.eq.s32.totalorder %s23_s23, 0  ;;  %p33_p2 = scmp.ne.s32.totalorder %s1369_s11, %s1365_s10 }
  0x2a   : > { %p34_p4 = scmp.eq.s32.totalorder %s1373_s12, 0  ;;  %p1185_p6 = scmp.lt.s32.totalorder %s1373_s12, 2 }
  0x2b   : > { %s1491_s8 = scalar_select %p24_p1, %s1369_s11, %s26_s22  }
  0x2c   : > { %p35_p8 = por %p34_p4, %p33_p2  ;;  %p1693_p10 = scmp.eq.s32.totalorder %s1422_s13, 1 }
  0x2d   : > { %s123_s18 = sand.u32 1, %s1369_s11   ;;  %s1076_s20 = sshll.u32 %s1373_s12, 9 }
  0x2e   : > { %p1495_p12 = por %p1693_p10, %p33_p2  ;;  %s1048_s24 = sshll.u32 %s123_s18, 5 }
  0x2f   : > { %s1504_s27 = scalar_lea.hbm %s1683_s0, %s1076_s20  ;;  %s127_s19 = scalar_lea.vmem [#allocation2], %s1048_s24 }
  0x30   : > { %s134_s22 = sshll.u32 %s127_s19, 4  ;;  %p1506_p11 = pnand %p1185_p6, %p35_p8  ;;  %s1510_s22 = int_to_ptr.vmem [resolvable:$true] %s134_s22 }
  0x31   : > { %s1512_s28 = scalar_lea.sflag [#allocation3], %s123_s18  ;;  %s1273_s29 = scalar_lea.hbm %s1504_s27, 512 }
  0x32   : > { %p1274_p13 = scmp.ne.s32.totalorder %s1504_s27, %s1273_s29  ;;  %p1275_p0 = pneg %p1506_p11 }
  0x33   : > { %s1278_s6 = scalar_lea.hbm %s1683_s0, 1024  ;;  %p1279_p7 = scmp.lt.u32.totalorder %s1504_s27, %s1683_s0 }
  0x34   : > { %p1276_p3 = pnand %p1275_p0, %p1274_p13  ;;  %p1280_p9 = scmp.lt.u32.totalorder %s1278_s6, %s1273_s29 }
  0x35   : > { %p1282_p2 = scmp.lt.u32.totalorder %s1273_s29, %s1504_s27 }
  0x36   : > { %p1277_p5 = pneg %p1276_p3  ;;  %p1281_p1 = por %p1280_p9, %p1279_p7 }
  0x38   : > { %p1283_p4 = por %p1282_p2, %p1281_p1 }
  0x3a   : > { %p1284_p6 = pnand %p1283_p4, %p1277_p5 }
  0x3c   : > { %1287 = shalt.err (!%p1284_p6)
}
  0x3d   : > { %s1288_s18 = scalar_lea.vmem %s1510_s22, 512  ;;  %s1378_s24 = smov [#allocation2]  }
  0x3e   : > { %p1289_p8 = scmp.ne.s32.totalorder %s1510_s22, %s1288_s18  ;;  %s1293_s25 = sshll.u32 %s1378_s24, 4  ;;  %s1294_s25 = int_to_ptr.vmem [resolvable:$false] %s1293_s25 }
  0x3f   : > { %s1295_s26 = scalar_lea.vmem %s1294_s25, 1024  ;;  %p1296_p3 = scmp.lt.s32.totalorder %s1510_s22, %s1294_s25 }
  0x40   : > { %p1291_p10 = pnand %p1289_p8, %p1275_p0  ;;  %p1297_p7 = scmp.lt.s32.totalorder %s1295_s26, %s1288_s18 }
  0x42   : > { %p1292_p13 = pneg %p1291_p10  ;;  %p1298_p9 = por %p1297_p7, %p1296_p3 }
  0x44   : > { %p1299_p1 = pnand %p1298_p9, %p1292_p13 }
  0x46   : > { %1302 = shalt.err (!%p1299_p1)
}
  0x47   : > { %1179 = dma.hbm_to_vmem [thread:$0]  (!%p1506_p11), %s1504_s27, 512, %s1510_s22, %s1512_s28, %s1376_s4, %s1376_s4, %s1377_s5  }
  0x48   : > { %p1696_p0 = scmp.ne.s32.totalorder %s1691_s17, 0 }
  0x49   : > { %s1546_s19 = sand.u32 (!%p1696_p0), 1, %s1365_s10   ;;  %p1697_p5 = scmp.ne.s32.totalorder (!%p1696_p0), %s1689_s15, 0 }
  0x4a   : > { %146 = sbr.rel (%p1696_p0) target bundleno = 1233 (0x4d1), region = 28  ;;  %s1052_s29 = sshll.u32 (!%p1696_p0), %s1546_s19, 5 }
  0x4b   : > { %s149_s30 = scalar_lea.sflag (!%p1696_p0), [#allocation3], %s1546_s19  ;;  %s152_s23 = scalar_lea.vmem (!%p1696_p0), [#allocation2], %s1052_s29 }
  0x51   : > { %1348 = dma.done.wait (%p1697_p5), %s149_s30, 512  }
  0x52   : > { %1350 = vsyncadd (%p1697_p5), %s149_s30, 4294966784  ;;  %p1698_p11 = scmp.eq.s32.totalorder %s1422_s13, 0 }
  0x54   : > { %1352 = dma.done.wait (%p1698_p11), [#allocation6], 512   ;;  %p1699_p2 = pmov %p1698_p11 }
  0x55   : > { %vm187_vm0 = vcmask 261120   ;;  %v183_v0 = vld [vmem:[#allocation5] sm:$0xff]  ;;  %v184_v1 = vld [vmem:[#allocation5 + $0x8] sm:$0xff]  ;;  %v185_v2 = vld [vmem:[#allocation5 + $0x10] sm:$0xff]  ;;  %v1379_v10 = vmov 0.0   ;;  %vm1380_vm1 = vmmov 0  }
  0x56   : > { %1354 = vsyncadd (%p1699_p2), [#allocation6], 4294966784  ;;  %v1156_v3 = vpack.c.bf16 %v184_v1, %v183_v0  ;;  %v186_v4 = vld [vmem:[#allocation5 + $0x18] sm:$0xff]  ;;  %v179_v5 = vld [vmem:[%s152_s23] sm:$0xff]  ;;  %1116 = vmatprep.subr.mxu1 %v1379_v10  ;;  %1118 = vmatprep.mubr.msk.f32.mxu1 %vm1380_vm1, %v1379_v10  ;;  %s1381_s15 = smov 112   ;;  %vm288_vm2 = vcmask 130048  }
  0x57   : > { %v1160_v6 = vpack.c.bf16 %v186_v4, %v185_v2  ;;  %1110 = vmatprep.mubr.msk.f32.mxu0 %vm187_vm0, %v179_v5  ;;  %v180_v7 = vld [vmem:[%s152_s23 + $0x8] sm:$0xff]  ;;  %v181_v8 = vld [vmem:[%s152_s23 + $0x10] sm:$0xff]  ;;  %v182_v9 = vld [vmem:[%s152_s23 + $0x18] sm:$0xff]  ;;  %vm594_vm3 = vcmask 64512   ;;  %s1382_s17 = smov 96   ;;  %s176_s4 = scalar_lea.vmem [#allocation7], %s1052_s29 }
  0x58   : > { %1157 = vmatprep.subr.bf16.mxu0 %v1156_v3  ;;  %s961_s5 = sshll.u32 %s176_s4, 4  ;;  %s1077_s27 = sshll.u32 %s1422_s13, 9  ;;  %s1633_s5 = int_to_ptr.vmem [resolvable:$true] %s961_s5 }
  0x59   : > { %1159 = vmatpush3.bf16.msra.mxu0 %v1156_v3  ;;  %s1638_s3 = scalar_lea.hbm %s1685_s2, %s1077_s27  ;;  %s948_s6 = scalar_lea.sflag [#allocation4], %s1546_s19 }
  0x5a   : > { %1161 = vmatprep.subr.bf16.mxu0 %v1160_v6  ;;  %s1303_s7 = scalar_lea.vmem %s1633_s5, 512  ;;  %s1383_s13 = smov [#allocation7]  }
  0x5b   : > { %p1304_p4 = scmp.ne.s32.totalorder %s1633_s5, %s1303_s7  ;;  %s1307_s20 = sshll.u32 %s1383_s13, 4  ;;  %s1308_s20 = int_to_ptr.vmem [resolvable:$false] %s1307_s20 }
  0x5c   : > { %s1309_s18 = scalar_lea.vmem %s1308_s20, 1024  ;;  %p1310_p10 = scmp.lt.s32.totalorder %s1633_s5, %s1308_s20 }
  0x5d   : > { %1163 = vmatpush3.bf16.msra.mxu0 %v1160_v6  ;;  %p1305_p6 = pnand %p1304_p4, %p1495_p12  ;;  %p1311_p13 = scmp.lt.s32.totalorder %s1309_s18, %s1303_s7 }
  0x5e   : > { %1131 = vmatprep.subr.mxu0 %v1379_v10 }
  0x5f   : > { %p1306_p8 = pneg %p1305_p6  ;;  %p1312_p3 = por %p1311_p13, %p1310_p10 }
  0x60   : > { %1111 = vmatmul.mubr.msk.f32.vlgmr.msra.gmra.mrb[0].mxu0 %vm187_vm0, %v180_v7 }
  0x61   : > { %1113 = vmatprep.mubr.msk.f32.mxu0 %vm187_vm0, %v181_v8  ;;  %p1313_p7 = pnand %p1312_p3, %p1306_p8 }
  0x64   : > { %1114 = vmatmul.mubr.msk.f32.gmra.mrb[2].mxu0 %vm187_vm0, %v182_v9 }
  0x65   : > { %1133 = vmatprep.mubr.msk.f32.mxu0 %vm1380_vm1, %v1379_v10 }
 0x133   : > { %v1570_v11 = vpop.f32.mrb[0].mxu0 }
 0x134   : > { %v266_v12 = vpop.f32.mrb[1].mxu0 }
 0x135   : > { %286 = vrot.lane.b32.xlu0 %v266_v12, %s1381_s15 }
 0x137   : > { %v1572_v13 = vpop.f32.mrb[2].mxu0 }
 0x138   : > { %v1574_v14 = vpop.f32.mrb[3].mxu0 }
 0x139   : > { %364 = vrot.lane.b32.xlu0 %v1570_v11, %s1381_s15  ;;  %441 = vrot.lane.b32.xlu1 %v1574_v14, %s1381_s15 }
 0x13d   : > { %518 = vrot.lane.b32.xlu1 %v1572_v13, %s1381_s15 }
 0x1a7   : > { %v287_v15 = vpop.permute.xlu0 %286 }
 0x1a8   : > { %1117 = vmatpush3.xpose.msk.msra.mxu1 %vm288_vm2, %v287_v15 }
 0x1a9   : > { %1121 = vmatprep.subr.mxu1 %v1379_v10 }
 0x1ab   : > { %1119 = vmatmul.mubr.msk.f32.vlgmr.msra.gmra.mrb[0].mxu1 %vm288_vm2, %v266_v12  ;;  %v365_v16 = vpop.permute.xlu0 %364  ;;  %v442_v17 = vpop.permute.xlu1 %441 }
 0x1ac   : > { %1122 = vmatpush3.xpose.msk.msra.mxu1 %vm288_vm2, %v365_v16  ;;  %1123 = vmatprep.mubr.msk.f32.mxu1 %vm1380_vm1, %v1379_v10 }
 0x1ad   : > { %1126 = vmatprep.subr.mxu1 %v1379_v10 }
 0x1af   : > { %1124 = vmatmul.mubr.msk.f32.vlgmr.msra.gmra.mrb[2].mxu1 %vm288_vm2, %v1570_v11  ;;  %v519_v18 = vpop.permute.xlu1 %518 }
 0x1b0   : > { %1127 = vmatpush3.xpose.msk.msra.mxu1 %vm288_vm2, %v442_v17  ;;  %1132 = vmatpush3.xpose.msk.msra.mxu0 %vm288_vm2, %v519_v18 }
 0x1b1   : > { %1128 = vmatprep.mubr.msk.f32.mxu1 %vm1380_vm1, %v1379_v10  ;;  %1136 = vmatprep.subr.mxu1 %v1379_v10 }
 0x1b2   : > { %1141 = vmatprep.subr.mxu0 %v1379_v10 }
 0x1b3   : > { %1129 = vmatmul.mubr.msk.f32.vlgmr.msra.gmra.mrb[4].mxu1 %vm288_vm2, %v1574_v14  ;;  %1134 = vmatmul.mubr.msk.f32.vlgmr.msra.gmra.mrb[4].mxu0 %vm288_vm2, %v1572_v13 }
 0x1b4   : > { %1138 = vmatprep.mubr.msk.f32.mxu1 %vm1380_vm1, %v1379_v10  ;;  %1143 = vmatprep.mubr.msk.f32.mxu0 %vm1380_vm1, %v1379_v10 }
 0x27e   : > { %v359_v19 = vpop.f32.mrb[0].mxu1 }
 0x27f   : > { %v1120_v20 = vpop.f32.mrb[1].mxu1  ;;  %v595_v21 = vsel %vm594_vm3, %v359_v19, -inf }
 0x280   : > { %596 = vmax.xlane.f32.xlu0 %v595_v21 }
 0x282   : > { %v436_v22 = vpop.f32.mrb[2].mxu1 }
 0x283   : > { %v1125_v23 = vpop.f32.mrb[3].mxu1  ;;  %v598_v24 = vsel %vm594_vm3, %v436_v22, -inf }
 0x284   : > { %599 = vmax.xlane.f32.xlu1 %v598_v24 }
 0x286   : > { %v513_v25 = vpop.f32.mrb[4].mxu1  ;;  %v590_v26 = vpop.f32.mrb[4].mxu0 }
 0x287   : > { %v1130_v27 = vpop.f32.mrb[5].mxu1  ;;  %v1135_v28 = vpop.f32.mrb[5].mxu0  ;;  %v601_v29 = vsel %vm594_vm3, %v513_v25, -inf  ;;  %v604_v30 = vsel %vm594_vm3, %v590_v26, -inf }
 0x288   : > { %602 = vmax.xlane.f32.xlu0 %v601_v29 }
 0x28c   : > { %605 = vmax.xlane.f32.xlu0 %v604_v30 }
 0x295   : > { %639 = vrot.lane.b32.xlu1 %v266_v12, %s1382_s17 }
 0x30d   : > { %v597_v31 = vpop.xlane.xlu0 %596 }
 0x30e   : > { %v607_v32 = vsub.f32 %v359_v19, %v597_v31 }
 0x310   : > { %v611_v33 = vmul.f32 1.442695, %v607_v32 }
 0x311   : > { %v600_v34 = vpop.xlane.xlu1 %599 }
 0x312   : > { %1229 = vpow2.f32 %v611_v33  ;;  %v608_v37 = vsub.f32 %v436_v22, %v600_v34 }
 0x314   : > { %v613_v41 = vmul.f32 1.442695, %v608_v37 }
 0x315   : > { %v603_v35 = vpop.xlane.xlu0 %602  ;;  %v640_v36 = vpop.permute.xlu1 %639 }
 0x316   : > { %1137 = vmatpush3.msra.mxu1 %v640_v36  ;;  %v609_v48 = vsub.f32 %v513_v25, %v603_v35 }
 0x317   : > { %1146 = vmatprep.subr.mxu1 %v1379_v10 }
 0x318   : > { %v615_v49 = vmul.f32 1.442695, %v609_v48 }
 0x319   : > { %v606_v38 = vpop.xlane.xlu0 %605 }
 0x31a   : > { %v610_v39 = vsub.f32 %v590_v26, %v606_v38 }
 0x31c   : > { %v1230_v40 = vpop.eup %1229  ;;  %v617_v42 = vmul.f32 1.442695, %v610_v39 }
 0x31d   : > { %v619_v43 = vsel %vm594_vm3, %v1230_v40, 0.0 }
 0x31e   : > { %1231 = vpow2.f32 %v617_v42  ;;  %620 = vadd.xlane.f32.xlu1 %v619_v43 }
 0x31f   : > { %1233 = vpow2.f32 %v613_v41 }
 0x320   : > { %1235 = vpow2.f32 %v615_v49 }
 0x328   : > { %v1232_v44 = vpop.eup %1231 }
 0x329   : > { %v628_v45 = vsel %vm594_vm3, %v1232_v44, 0.0  ;;  %v1234_v46 = vpop.eup %1233 }
 0x32a   : > { %629 = vadd.xlane.f32.xlu0 %v628_v45  ;;  %v622_v47 = vsel %vm594_vm3, %v1234_v46, 0.0  ;;  %v1236_v50 = vpop.eup %1235 }
 0x32b   : > { %v625_v51 = vsel %vm594_vm3, %v1236_v50, 0.0 }
 0x32e   : > { %623 = vadd.xlane.f32.xlu0 %v622_v47 }
 0x32f   : > { %791 = vrot.lane.b32.xlu1 %v1574_v14, %s1382_s17 }
 0x344   : > { %715 = vrot.lane.b32.xlu0 %v1570_v11, %s1382_s17 }
 0x353   : > { %626 = vadd.xlane.f32.xlu1 %v625_v51 }
 0x364   : > { %867 = vrot.lane.b32.xlu1 %v1572_v13, %s1382_s17 }
 0x3ab   : > { %v621_v52 = vpop.xlane.xlu1 %620 }
 0x3ac   : > { %1237 = vrcp.f32 %v621_v52 }
 0x3af   : > { %v792_v56 = vpop.permute.xlu1 %791 }
 0x3b6   : > { %v1238_v53 = vpop.eup %1237 }
 0x3b7   : > { %v632_v54 = vmul.f32 %v1238_v53, %v1230_v40  ;;  %v630_v55 = vpop.xlane.xlu0 %629 }
 0x3b9   : > { %1139 = vmatmul.mubr.msk.f32.vlgmr.msra.gmra.mrb[6].mxu1 %vm594_vm3, %v632_v54 }
 0x3ba   : > { %1147 = vmatpush3.msra.mxu1 %v792_v56  ;;  %1148 = vmatprep.mubr.msk.f32.mxu1 %vm1380_vm1, %v1379_v10 }
 0x3bb   : > { %v624_v57 = vpop.xlane.xlu0 %623 }
 0x3bc   : > { %1239 = vrcp.f32 %v624_v57 }
 0x3bd   : > { %1241 = vrcp.f32 %v630_v55 }
 0x3bf   : > { %v716_v58 = vpop.permute.xlu0 %715 }
 0x3c0   : > { %1142 = vmatpush3.msra.mxu0 %v716_v58 }
 0x3c1   : > { %1151 = vmatprep.subr.mxu0 %v1379_v10 }
 0x3c6   : > { %v1240_v59 = vpop.eup %1239 }
 0x3c7   : > { %v634_v60 = vmul.f32 %v1240_v59, %v1234_v46  ;;  %v1242_v62 = vpop.eup %1241 }
 0x3c8   : > { %v638_v63 = vmul.f32 %v1242_v62, %v1232_v44 }
 0x3c9   : > { %1144 = vmatmul.mubr.msk.f32.vlgmr.msra.gmra.mrb[6].mxu0 %vm594_vm3, %v634_v60 }
 0x3ca   : > { %1153 = vmatprep.mubr.msk.f32.mxu0 %vm1380_vm1, %v1379_v10 }
 0x3e0   : > { %v627_v61 = vpop.xlane.xlu1 %626 }
 0x3e1   : > { %1243 = vrcp.f32 %v627_v61 }
 0x3e4   : > { %v868_v0 = vpop.permute.xlu1 %867 }
 0x3e5   : > { %1152 = vmatpush3.msra.mxu0 %v868_v0 }
 0x3e6   : > { %1154 = vmatmul.mubr.msk.f32.vlgmr.msra.gmra.mrb[8].mxu0 %vm594_vm3, %v638_v63 }
 0x3eb   : > { %v1244_v1 = vpop.eup %1243 }
 0x3ec   : > { %v636_v2 = vmul.f32 %v1244_v1, %v1236_v50 }
 0x3ee   : > { %1149 = vmatmul.mubr.msk.f32.vlgmr.msra.gmra.mrb[8].mxu1 %vm594_vm3, %v636_v2 }
 0x48c   : > { %v711_v3 = vpop.f32.mrb[6].mxu1 }
 0x48d   : > { %943 = vst.msk [vmem:[%s176_s4] sm:$0xff] %vm288_vm2, %v711_v3  ;;  %v1140_v4 = vpop.f32.mrb[7].mxu1 }
 0x49c   : > { %v787_v5 = vpop.f32.mrb[6].mxu0 }
 0x49d   : > { %944 = vst.msk [vmem:[%s176_s4 + $0x8] sm:$0xff] %vm288_vm2, %v787_v5  ;;  %v1145_v6 = vpop.f32.mrb[7].mxu0 }
 0x4b9   : > { %v939_v7 = vpop.f32.mrb[8].mxu0 }
 0x4ba   : > { %946 = vst.msk [vmem:[%s176_s4 + $0x18] sm:$0xff] %vm288_vm2, %v939_v7  ;;  %v1155_v8 = vpop.f32.mrb[9].mxu0 }
 0x4c1   : > { %v863_v9 = vpop.f32.mrb[8].mxu1 }
 0x4c2   : > { %945 = vst.msk [vmem:[%s176_s4 + $0x10] sm:$0xff] %vm288_vm2, %v863_v9  ;;  %v1150_v10 = vpop.f32.mrb[9].mxu1 }
 0x4c3   : > { %1316 = shalt.err (!%p1313_p7)
}
 0x4c4   : > { %s1317_s24 = scalar_lea.hbm %s1638_s3, 512  ;;  %s1321_s29 = scalar_lea.hbm %s1685_s2, 1024 }
 0x4c5   : > { %p1318_p9 = scmp.ne.s32.totalorder %s1638_s3, %s1317_s24  ;;  %p1322_p5 = scmp.lt.u32.totalorder %s1638_s3, %s1685_s2 }
 0x4c6   : > { %p1323_p11 = scmp.lt.u32.totalorder %s1321_s29, %s1317_s24  ;;  %p1325_p4 = scmp.lt.u32.totalorder %s1317_s24, %s1638_s3 }
 0x4c7   : > { %p1319_p1 = pnand %p1318_p9, %p1495_p12 }
 0x4c8   : > { %p1324_p2 = por %p1323_p11, %p1322_p5 }
 0x4c9   : > { %p1320_p0 = pneg %p1319_p1 }
 0x4ca   : > { %p1326_p6 = por %p1325_p4, %p1324_p2 }
 0x4cc   : > { %p1327_p8 = pnand %p1326_p6, %p1320_p0 }
 0x4ce   : > { %1330 = shalt.err (!%p1327_p8)
}
 0x4cf   : > { %s1384_s15 = smov 128   ;;  %s1385_s17 = smov 8  }
 0x4d0   : > { %1170 = dma.vmem_to_hbm [thread:$0]  (%p1495_p12), %s1633_s5, 512, %s1638_s3, %s948_s6, %s1384_s15, %s1384_s15, %s1385_s17  }
 0x4d1 PF: > { %s976_s4 = sand.u32 1, %s1361_s9   ;;  %p1700_p10 = scmp.ne.s32.totalorder %s1690_s16, 0 }
 0x4d2   : > { %p1701_p13 = scmp.ge.s32.totalorder %s1373_s12, 2  ;;  %s977_s27 = scalar_lea.sflag [#allocation4], %s976_s4 }
 0x4d4   : > { %p1181_p3 = pnand %p1701_p13, %p1700_p10 }
 0x4d6   : > { %1356 = dma.done.wait (!%p1181_p3), %s977_s27, 512  }
 0x4d7   : > { %1358 = vsyncadd (!%p1181_p3), %s977_s27, 4294966784  ;;  %p16_p7 = scmp.ge.s32.totalorder %s1457_s21, 4   ;;  %s1702_s9 = smov %s1365_s10 }
 0x4d8   : > { %s1703_s10 = smov %s1369_s11  ;;  %s1704_s11 = smov %s1491_s8 }
 0x4d9   : > { %s1705_s12 = smov %s1457_s21  ;;  %18 = sbr.rel (!%p16_p7) target bundleno = 6 (0x6), region = 77 }
 0x4e0   :  { %982 = vsyncpa [#allocation3], 1 }
 0x4e1   :  { %984 = vsyncpa [#allocation3 + $0x1], 1 }
 0x4e2   :  { %985 = vsyncpa [#allocation6], 1 }
 0x4e3   :  { %986 = vsyncpa [#allocation4], 1 }
 0x4e4   :  { %988 = vsyncpa [#allocation4 + $0x1], 1 }

</bundles_post_ra>
